<compile_context>
chip_gen: v7x
topology: tpu7x:2x2x1
jax: 0.10.0
libtpu: 0.0.40
codegen_flags: <defaults>
</compile_context>

<pallas_src>
import functools

import jax
import jax.numpy as jnp
from jax.experimental import pallas as pl
from jax.experimental.pallas import tpu as pltpu


def _round_up(v, m):
    return ((v + m - 1) // m) * m


def _vmem_capacity_bytes():
    try:
        return int(pltpu.get_tpu_info().vmem_capacity_bytes)
    except Exception:
        return 128 << 20      # v5e / v6e default if the query is unavailable


def _attention_kernel(x_ref, w1_ref, b1_ref, w2_ref, b2_ref, o_ref, acc_ref):
    j = pl.program_id(1)
    tn = w1_ref.shape[1]                         # static column-tile width

    @pl.when(j == 0)
    def _init():
        acc_ref[...] = jnp.zeros_like(acc_ref)

    # Resident b1 / w2 rows; slice the current tn window in-kernel (no per-step DMA).
    col = pl.multiple_of(j * tn, tn)
    b1_tile = b1_ref[:, pl.ds(col, tn)].astype(jnp.float32)      # (1, tn)
    w2_tile = w2_ref[:, pl.ds(col, tn)].astype(jnp.float32)      # (1, tn)

    # fc1 column tile (MXU, f32 accumulate) + bias + ReLU.
    h = jnp.dot(x_ref[...], w1_ref[...], preferred_element_type=jnp.float32)
    h = jnp.maximum(h + b1_tile, 0.0)                            # (tb, tn) f32

    # Partial fc2 reduction: fold tn lanes into a lane-dense (tb, 128) accumulator
    # using static 128-lane sub-slices (VALU adds; no per-step XLU reduce).
    hw = h * w2_tile
    part = hw[:, 0:128]
    for k in range(1, tn // 128):
        part = part + hw[:, k * 128:(k + 1) * 128]
    acc_ref[...] += part

    @pl.when(j == pl.num_programs(1) - 1)
    def _finalize():
        # Single 128 -> 1 cross-lane reduce, then sigmoid + gate.
        s = jnp.sum(acc_ref[...], axis=-1, keepdims=True)        # (tb, 1) f32
        attn = jax.nn.sigmoid(s + b2_ref[0])
        if o_ref.dtype == jnp.float32:
            o_ref[...] = x_ref[...] * attn
        else:
            # bf16 inputs: gate in the input dtype (bf16 VALU on v6e/v7x).
            o_ref[...] = (x_ref[...] * attn.astype(o_ref.dtype)).astype(o_ref.dtype)


@functools.partial(jax.jit, static_argnames=("tb", "tn", "vmem_limit"))
def _attention_call(x, w1_p, b1_p, w2_p, b2_s, *, tb, tn, vmem_limit):
    B, D = x.shape
    D_pad = w1_p.shape[0]
    x_p = jnp.pad(x, ((0, 0), (0, D_pad - D))) if D_pad != D else x

    grid = (pl.cdiv(B, tb), D_pad // tn)

    out_p = pl.pallas_call(
        _attention_kernel,
        out_shape=jax.ShapeDtypeStruct((B, D_pad), x.dtype),
        grid_spec=pltpu.PrefetchScalarGridSpec(
            num_scalar_prefetch=0,
            grid=grid,
            in_specs=[
                pl.BlockSpec((tb, D_pad), lambda i, j: (i, 0)),      # x (resident over j)
                pl.BlockSpec((D_pad, tn), lambda i, j: (0, j)),      # W1 column tile
                pl.BlockSpec((1, D_pad), lambda i, j: (0, 0)),       # b1 (resident)
                pl.BlockSpec((1, D_pad), lambda i, j: (0, 0)),       # w2 (resident)
                pl.BlockSpec(memory_space=pltpu.MemorySpace.SMEM),   # b2 scalar
            ],
            out_specs=pl.BlockSpec((tb, D_pad), lambda i, j: (i, 0)),
            scratch_shapes=[pltpu.VMEM((tb, 128), jnp.float32)],     # lane-dense fc2 acc
        ),
        compiler_params=pltpu.CompilerParams(
            dimension_semantics=("parallel", "arbitrary"),
            vmem_limit_bytes=vmem_limit),
    )(x_p, w1_p, b1_p, w2_p, b2_s)

    return out_p[:, :D] if D_pad != D else out_p


def prepare_params(w1, b1, w2, b2):
    """Pad weights once (outside the per-call path). w1: (D,D) [in,out]; b1,w2: (1,D)."""
    D = w1.shape[0]
    D_pad = max(128, _round_up(D, 128))
    pad = D_pad - D
    if pad:
        w1 = jnp.pad(w1, ((0, pad), (0, pad)))
        b1 = jnp.pad(b1, ((0, 0), (0, pad)))
        w2 = jnp.pad(w2, ((0, 0), (0, pad)))
    b2 = jnp.reshape(b2, (1,)).astype(jnp.float32)      # scalar -> SMEM
    return (w1, b1, w2, b2)


def attention_module(x, padded_params, *, block_b=None, block_n=None):
    """x: (B, D); padded_params from prepare_params()."""
    w1_p, b1_p, w2_p, b2_s = padded_params
    B, D = x.shape
    D_pad = w1_p.shape[0]
    x_itemsize = jnp.dtype(x.dtype).itemsize
    w_itemsize = jnp.dtype(w1_p.dtype).itemsize

    capacity = _vmem_capacity_bytes()
    budget = capacity * 3 // 4          # ~96 MiB on v5e/v6e, ~48 MiB on v7x

    # --- column tile: bigger on big-VMEM chips (fewer j-steps / DMA descriptors) -----
    if block_n is None:
        if D_pad % 512 == 0 and capacity >= (96 << 20):
            tn = 512
        elif D_pad % 256 == 0:
            tn = 256
        else:
            tn = 128
    else:
        tn = block_n
    assert D_pad % tn == 0 and tn % 128 == 0

    # --- batch tile: above the per-generation W1 re-stream ridge, sublane aligned ----
    row_mult = 8 if x_itemsize >= 4 else 16          # bf16 packs 2 rows per sublane
    if block_b is None:
        tb = 512 if x_itemsize >= 4 else 1024
    else:
        tb = _round_up(block_b, row_mult)
    tb = max(row_mult, min(tb, _round_up(B, row_mult)))
    # v7x: when the whole batch fits one tile, split it so the "parallel" batch axis
    # gives both TensorCores work (no-op on single-TC chips).
    if block_b is None and B <= tb and B >= 2 * row_mult:
        tb = _round_up(-(-B // 2), row_mult)

    def vmem_need(tb_):
        return (2 * D_pad * tn * w_itemsize          # W1 column tile (double-buffered)
                + 2 * tb_ * D_pad * x_itemsize       # x tile, resident over j (2 bufs)
                + 2 * tb_ * D_pad * x_itemsize       # out tile (2 bufs)
                + tb_ * 128 * 4                      # lane-dense fc2 accumulator
                + 2 * 2 * 8 * D_pad * w_itemsize)    # resident b1 / w2 rows (padded)

    while block_b is None and tb > 4 * row_mult and vmem_need(tb) > budget:
        tb = max(row_mult, _round_up(tb // 2, row_mult))

    headroom = 8 << 20                               # compiler scratch / semaphores
    vmem_limit = max(vmem_need(tb) * 5 // 4, 32 << 20)
    vmem_limit = int(min(vmem_limit, capacity - headroom))   # <= ~56 MiB on v7x

    return _attention_call(x, w1_p, b1_p, w2_p, b2_s,
                           tb=int(tb), tn=int(tn), vmem_limit=vmem_limit)


def _init_params(key, input_dim):
    # Deterministic synthetic init, mimicking nn.Linear's uniform(+/- 1/sqrt(fan_in)).
    k1, k2, k3, k4 = jax.random.split(key, 4)
    bound = 1.0 / (input_dim ** 0.5)
    w1 = jax.random.uniform(k1, (input_dim, input_dim), jnp.float32, -bound, bound)
    b1 = jax.random.uniform(k2, (1, input_dim), jnp.float32, -bound, bound)
    w2 = jax.random.uniform(k3, (1, input_dim), jnp.float32, -bound, bound)
    b2 = jax.random.uniform(k4, (1,), jnp.float32, -bound, bound)
    return w1, b1, w2, b2


def _reference(x, w1, b1, w2, b2):
    h = jnp.maximum(x @ w1 + b1, 0.0)
    attn = jax.nn.sigmoid(jnp.sum(h * w2, axis=-1, keepdims=True) + b2[0])
    return x * attn


if __name__ == "__main__":
    key = jax.random.PRNGKey(0)
    kx, kp, kx2, kp2 = jax.random.split(key, 4)

    # Small test consistent with the module (batch=8, input_dim=32).
    batch, input_dim = 8, 32
    x = jax.random.normal(kx, (batch, input_dim), jnp.float32)
    w1, b1, w2, b2 = _init_params(kp, input_dim)
    params = prepare_params(w1, b1, w2, b2)

    out = jax.block_until_ready(attention_module(x, params))
    ref = _reference(x, w1, b1, w2, b2)
    assert out.shape == x.shape and out.dtype == x.dtype
    assert jnp.allclose(out, ref, atol=1e-5, rtol=1e-5)

    # Second (still small) case exercising the multi-step grid: ragged batch tile
    # (B % tb != 0) and multiple fc1-column accumulation steps with the lane-dense acc.
    batch2, dim2 = 20, 384
    x2 = jax.random.normal(kx2, (batch2, dim2), jnp.float32)
    w1b, b1b, w2b, b2b = _init_params(kp2, dim2)
    params2 = prepare_params(w1b, b1b, w2b, b2b)
    out2 = jax.block_until_ready(
        attention_module(x2, params2, block_b=8, block_n=128))
    ref2 = _reference(x2, w1b, b1b, w2b, b2b)
    assert jnp.allclose(out2, ref2, atol=1e-4, rtol=1e-4)

    print("KERNEL_OK")
</pallas_src>

<mosaic_0001>
module attributes {stable_mosaic.version = 11 : i64} {
  func.func @_attention_kernel(%arg0: i32, %arg1: i32, %arg2: memref<8x128xf32, #tpu.memory_space<vmem>>, %arg3: memref<128x128xf32, #tpu.memory_space<vmem>>, %arg4: memref<1x128xf32, #tpu.memory_space<vmem>>, %arg5: memref<1x128xf32, #tpu.memory_space<vmem>>, %arg6: memref<1xf32, #tpu.memory_space<smem>>, %arg7: memref<8x128xf32, #tpu.memory_space<vmem>>, %arg8: memref<8x128xf32, #tpu.memory_space<vmem>>) attributes {dimension_semantics = [#tpu.dimension_semantics<parallel>, #tpu.dimension_semantics<arbitrary>], iteration_bounds = array<i64: 1, 1>, scalar_prefetch = 0 : i64, scratch_operands = 1 : i64, tpu.core_type = #tpu.core_type<tc>, window_params = [{transform_indices = @transform_0, window_bounds = array<i64: 8, 128>}, {transform_indices = @transform_1, window_bounds = array<i64: 128, 128>}, {pipeline_mode = #tpu.pipeline_mode<synchronous>, transform_indices = @transform_2, window_bounds = array<i64: 1, 128>}, {pipeline_mode = #tpu.pipeline_mode<synchronous>, transform_indices = @transform_3, window_bounds = array<i64: 1, 128>}, {transform_indices = @transform_4, window_bounds = array<i64: 1>}, {transform_indices = @transform_5, window_bounds = array<i64: 8, 128>}]} {
    %c0_i32 = arith.constant 0 : i32
    %0 = arith.cmpi eq, %arg1, %c0_i32 : i32
    %1 = arith.extui %0 : i1 to i32
    %c0_i32_0 = arith.constant 0 : i32
    %2 = arith.cmpi ne, %1, %c0_i32_0 : i32
    scf.if %2 {
      %cst_13 = arith.constant 0.000000e+00 : f32
      %24 = vector.broadcast %cst_13 : f32 to vector<8x128xf32>
      %c0_14 = arith.constant 0 : index
      %c0_15 = arith.constant 0 : index
      %25 = vector.load %arg8[%c0_14, %c0_15] : memref<8x128xf32, #tpu.memory_space<vmem>>, vector<8x128xf32>
      tpu.vector_store %arg8[%c0_14, %c0_15], %24 {strides = array<i32>} : memref<8x128xf32, #tpu.memory_space<vmem>>, vector<8x128xf32>,
    } else {
    }
    %c128_i32 = arith.constant 128 : i32
    %3 = arith.muli %arg1, %c128_i32 : i32
    %4 = tpu.assume_multiple %3, 128 : i32
    %c0 = arith.constant 0 : index
    %5 = arith.index_cast %4 : i32 to index
    %6 = vector.load %arg4[%c0, %5] : memref<1x128xf32, #tpu.memory_space<vmem>>, vector<1x128xf32>
    %c0_1 = arith.constant 0 : index
    %7 = arith.index_cast %4 : i32 to index
    %8 = vector.load %arg5[%c0_1, %7] : memref<1x128xf32, #tpu.memory_space<vmem>>, vector<1x128xf32>
    %c0_2 = arith.constant 0 : index
    %c0_3 = arith.constant 0 : index
    %9 = vector.load %arg2[%c0_2, %c0_3] : memref<8x128xf32, #tpu.memory_space<vmem>>, vector<8x128xf32>
    %c0_4 = arith.constant 0 : index
    %c0_5 = arith.constant 0 : index
    %10 = vector.load %arg3[%c0_4, %c0_5] : memref<128x128xf32, #tpu.memory_space<vmem>>, vector<128x128xf32>
    %cst = arith.constant dense<0.000000e+00> : vector<8x128xf32>
    %11 = tpu.matmul %9, %10, %cst {dimension_numbers = #tpu.dot_dimension_numbers<[1], [0], [0], [1], [0, 0, 1, 1], [], []>} : vector<8x128xf32>, vector<128x128xf32>, vector<8x128xf32> -> vector<8x128xf32>
    %12 = vector.broadcast %6 : vector<1x128xf32> to vector<8x128xf32>
    %13 = arith.addf %11, %12 : vector<8x128xf32>
    %cst_6 = arith.constant 0.000000e+00 : f32
    %14 = vector.broadcast %cst_6 : f32 to vector<8x128xf32>
    %15 = arith.maximumf %13, %14 : vector<8x128xf32>
    %16 = vector.broadcast %8 : vector<1x128xf32> to vector<8x128xf32>
    %17 = arith.mulf %15, %16 : vector<8x128xf32>
    %c0_7 = arith.constant 0 : index
    %c0_8 = arith.constant 0 : index
    %18 = vector.load %arg8[%c0_7, %c0_8] : memref<8x128xf32, #tpu.memory_space<vmem>>, vector<8x128xf32>
    %19 = arith.addf %18, %17 : vector<8x128xf32>
    %c0_9 = arith.constant 0 : index
    %c0_10 = arith.constant 0 : index
    %20 = vector.load %arg8[%c0_9, %c0_10] : memref<8x128xf32, #tpu.memory_space<vmem>>, vector<8x128xf32>
    tpu.vector_store %arg8[%c0_9, %c0_10], %19 {strides = array<i32>} : memref<8x128xf32, #tpu.memory_space<vmem>>, vector<8x128xf32>,
    %c0_i32_11 = arith.constant 0 : i32
    %21 = arith.cmpi eq, %arg1, %c0_i32_11 : i32
    %22 = arith.extui %21 : i1 to i32
    %c0_i32_12 = arith.constant 0 : i32
    %23 = arith.cmpi ne, %22, %c0_i32_12 : i32
    scf.if %23 {
      %c0_13 = arith.constant 0 : index
      %c0_14 = arith.constant 0 : index
      %24 = vector.load %arg8[%c0_13, %c0_14] : memref<8x128xf32, #tpu.memory_space<vmem>>, vector<8x128xf32>
      %cst_15 = arith.constant dense<0.000000e+00> : vector<8xf32>
      %25 = vector.multi_reduction <add>, %24, %cst_15 [1] : vector<8x128xf32> to vector<8xf32>
      %26 = vector.shape_cast %25 : vector<8xf32> to vector<8x1xf32>
      %c0_16 = arith.constant 0 : index
      %27 = memref.load %arg6[%c0_16] : memref<1xf32, #tpu.memory_space<smem>>
      %28 = vector.broadcast %27 : f32 to vector<8x1xf32>
      %29 = arith.addf %26, %28 : vector<8x1xf32>
      %30 = arith.negf %29 : vector<8x1xf32>
      %31 = math.exp %30 : vector<8x1xf32>
      %cst_17 = arith.constant 1.000000e+00 : f32
      %32 = vector.broadcast %cst_17 : f32 to vector<8x1xf32>
      %33 = arith.addf %32, %31 : vector<8x1xf32>
      %34 = arith.divf %32, %33 : vector<8x1xf32>
      %c0_18 = arith.constant 0 : index
      %c0_19 = arith.constant 0 : index
      %35 = vector.load %arg2[%c0_18, %c0_19] : memref<8x128xf32, #tpu.memory_space<vmem>>, vector<8x128xf32>
      %36 = vector.broadcast %34 : vector<8x1xf32> to vector<8x128xf32>
      %37 = arith.mulf %35, %36 : vector<8x128xf32>
      %c0_20 = arith.constant 0 : index
      %c0_21 = arith.constant 0 : index
      %38 = vector.load %arg7[%c0_20, %c0_21] : memref<8x128xf32, #tpu.memory_space<vmem>>, vector<8x128xf32>
      tpu.vector_store %arg7[%c0_20, %c0_21], %37 {strides = array<i32>} : memref<8x128xf32, #tpu.memory_space<vmem>>, vector<8x128xf32>,
    } else {
    }
    return
  }
  func.func @transform_0(%arg0: i32, %arg1: i32) -> (i32, i32) {
    %c0_i32 = arith.constant 0 : i32
    %c0_i32_0 = arith.constant 0 : i32
    return %arg0, %c0_i32 : i32, i32
  }
  func.func @transform_1(%arg0: i32, %arg1: i32) -> (i32, i32) {
    %c0_i32 = arith.constant 0 : i32
    %c0_i32_0 = arith.constant 0 : i32
    return %c0_i32, %arg1 : i32, i32
  }
  func.func @transform_2(%arg0: i32, %arg1: i32) -> (i32, i32) {
    %c0_i32 = arith.constant 0 : i32
    %c0_i32_0 = arith.constant 0 : i32
    %c0_i32_1 = arith.constant 0 : i32
    return %c0_i32, %c0_i32_0 : i32, i32
  }
  func.func @transform_3(%arg0: i32, %arg1: i32) -> (i32, i32) {
    %c0_i32 = arith.constant 0 : i32
    %c0_i32_0 = arith.constant 0 : i32
    %c0_i32_1 = arith.constant 0 : i32
    return %c0_i32, %c0_i32_0 : i32, i32
  }
  func.func @transform_4(%arg0: i32, %arg1: i32) -> i32 {
    %c0_i32 = arith.constant 0 : i32
    %c0_i32_0 = arith.constant 0 : i32
    return %c0_i32 : i32
  }
  func.func @transform_5(%arg0: i32, %arg1: i32) -> (i32, i32) {
    %c0_i32 = arith.constant 0 : i32
    %c0_i32_0 = arith.constant 0 : i32
    return %arg0, %c0_i32 : i32, i32
  }
}

</mosaic_0001>

<bundles_post_ra>
// kernel: _attention_call.1
= control target key start
LH: loop header
LB: loop body
LE: loop exit
PB: predicated region body
PF: predicated region fallthrough
CT: control target
= control target key end

     0   :  { %11 = vsyncpa [#allocation5], 0  ;;  %s398_s0 = inlined_call_operand.vmem [shape: f32[8,128], index: 0, kind: input, shape index: {}]   ;;  %s399_s1 = inlined_call_operand.hbm [shape: f32[128,128], index: 1, kind: input, shape index: {}]   ;;  %s400_s2 = inlined_call_operand.vmem [shape: f32[1,128], index: 2, kind: input, shape index: {}]   ;;  %s401_s3 = inlined_call_operand.vmem [shape: f32[1,128], index: 3, kind: input, shape index: {}]   ;;  %s402_s4 = inlined_call_operand.<no memory space> [shape: f32[1], index: 4, kind: input, shape index: {}]   ;;  %s403_s5 = inlined_call_operand.hbm [shape: f32[8,128], index: 5, kind: output, shape index: {}]  }
   0x1   :  { %12 = vsyncpa [#allocation6], 0  ;;  %s325_s18 = smov [#allocation4]   ;;  %s277_s22 = scalar_lea.hbm %s399_s1, 2048 }
   0x2   :  { %s20_s19 = sshll.u32 %s325_s18, 4  ;;  %p278_p0 = scmp.ne.s32.totalorder %s399_s1, %s277_s22  ;;  %s21_s19 = int_to_ptr.vmem [resolvable:$true] %s20_s19 }
   0x3   :  { %p281_p1 = scmp.lt.u32.totalorder %s277_s22, %s399_s1 }
   0x5   :  { %p283_p2 = pnand %p281_p1, %p278_p0 }
   0x7   :  { %286 = shalt.err (!%p283_p2)
}
   0x8   :  { %s287_s27 = scalar_lea.vmem %s21_s19, 2048  ;;  %p292_p4 = scmp.lt.s32.totalorder %s21_s19, %s21_s19 }
   0x9   :  { %p288_p3 = scmp.ne.s32.totalorder %s21_s19, %s287_s27  ;;  %p293_p5 = scmp.lt.s32.totalorder %s287_s27, %s287_s27 }
   0xb   :  { %p294_p6 = por %p293_p5, %p292_p4 }
   0xd   :  { %p295_p7 = pnand %p294_p6, %p288_p3 }
   0xf   :  { %298 = shalt.err (!%p295_p7)
}
  0x10   :  { %s326_s28 = smov 128   ;;  %s327_s29 = smov 8  }
  0x11   :  { %26 = dma.hbm_to_vmem [thread:$0]  %s399_s1, 2048, %s21_s19, [#allocation5], %s326_s28, %s326_s28, %s327_s29  }
  0x12   :  { %321 = dma.done.wait [#allocation5], 2048  }
  0x13   :  { %322 = vsyncadd [#allocation5], 4294965248  ;;  %v328_v0 = vmov 0.0|0.0   ;;  %vm329_vm0 = vmmov 0   ;;  %v330_v1 = vmov 0.0   ;;  %v49_v2 = vld [vmem:[#allocation4] sm:$0xff]  ;;  %v159_v34 = vstv %s402_s4 }
  0x14   :  { %242 = vmatprep.subr.bf16.mxu0 %v328_v0  ;;  %239 = vmatprep.mubr.msk.f32.mxu0 %vm329_vm0, %v330_v1  ;;  %v50_v3 = vld [vmem:[#allocation4 + $0x8] sm:$0xff]  ;;  %v51_v4 = vld [vmem:[#allocation4 + $0x10] sm:$0xff]  ;;  %v52_v6 = vld [vmem:[#allocation4 + $0x18] sm:$0xff] }
  0x15   :  { %v243_v5 = vpack.c.bf16 %v50_v3, %v49_v2  ;;  %v246_v7 = vpack.c.bf16 %v52_v6, %v51_v4  ;;  %v53_v8 = vld [vmem:[#allocation4 + $0x20] sm:$0xff]  ;;  %v54_v9 = vld [vmem:[#allocation4 + $0x28] sm:$0xff]  ;;  %v55_v11 = vld [vmem:[#allocation4 + $0x30] sm:$0xff] }
  0x16   :  { %v249_v10 = vpack.c.bf16 %v54_v9, %v53_v8  ;;  %v56_v12 = vld [vmem:[#allocation4 + $0x38] sm:$0xff]  ;;  %v57_v14 = vld [vmem:[#allocation4 + $0x40] sm:$0xff]  ;;  %v58_v15 = vld [vmem:[#allocation4 + $0x48] sm:$0xff] }
  0x17   :  { %244 = vmatpush3.bf16.msra.mxu0 %v243_v5  ;;  %v252_v13 = vpack.c.bf16 %v56_v12, %v55_v11  ;;  %v255_v16 = vpack.c.bf16 %v58_v15, %v57_v14  ;;  %v59_v17 = vld [vmem:[#allocation4 + $0x50] sm:$0xff]  ;;  %v60_v18 = vld [vmem:[#allocation4 + $0x58] sm:$0xff]  ;;  %v61_v20 = vld [vmem:[#allocation4 + $0x60] sm:$0xff] }
  0x18   :  { %245 = vmatprep.subr.bf16.mxu0 %v328_v0  ;;  %v258_v19 = vpack.c.bf16 %v60_v18, %v59_v17  ;;  %v62_v21 = vld [vmem:[#allocation4 + $0x68] sm:$0xff]  ;;  %v63_v23 = vld [vmem:[#allocation4 + $0x70] sm:$0xff]  ;;  %v64_v24 = vld [vmem:[#allocation4 + $0x78] sm:$0xff] }
  0x19   :  { %v261_v22 = vpack.c.bf16 %v62_v21, %v61_v20  ;;  %v264_v25 = vpack.c.bf16 %v64_v24, %v63_v23  ;;  %v48_v26 = vld [vmem:[%s398_s0] sm:$0xff]  ;;  %s331_s0 = smov [#allocation7]  }
  0x1a   :  { %v187_v27 = vld [vmem:[%s400_s2] ss:$0 sm:$0xff]  ;;  %s176_s2 = sshll.u32 %s331_s0, 4  ;;  %s177_s2 = int_to_ptr.vmem [resolvable:$true] %s176_s2 }
  0x1b   :  { %247 = vmatpush3.bf16.msra.mxu0 %v246_v7  ;;  %v188_v31 = vld [vmem:[%s401_s3] ss:$0 sm:$0xff]  ;;  %s299_s3 = scalar_lea.vmem %s177_s2, 128  ;;  %p304_p9 = scmp.lt.s32.totalorder %s177_s2, %s177_s2 }
  0x1c   :  { %248 = vmatprep.subr.bf16.mxu0 %v328_v0  ;;  %p300_p8 = scmp.ne.s32.totalorder %s177_s2, %s299_s3  ;;  %p305_p10 = scmp.lt.s32.totalorder %s299_s3, %s299_s3 }
  0x1e   :  { %p306_p11 = por %p305_p10, %p304_p9 }
  0x1f   :  { %250 = vmatpush3.bf16.msra.mxu0 %v249_v10 }
  0x20   :  { %251 = vmatprep.subr.bf16.mxu0 %v328_v0  ;;  %p307_p12 = pnand %p306_p11, %p300_p8 }
  0x23   :  { %253 = vmatpush3.bf16.msra.mxu0 %v252_v13 }
  0x24   :  { %254 = vmatprep.subr.bf16.mxu0 %v328_v0 }
  0x27   :  { %256 = vmatpush3.bf16.msra.mxu0 %v255_v16 }
  0x28   :  { %257 = vmatprep.subr.bf16.mxu0 %v328_v0 }
  0x2b   :  { %259 = vmatpush3.bf16.msra.mxu0 %v258_v19 }
  0x2c   :  { %260 = vmatprep.subr.bf16.mxu0 %v328_v0 }
  0x2f   :  { %262 = vmatpush3.bf16.msra.mxu0 %v261_v22 }
  0x30   :  { %263 = vmatprep.subr.bf16.mxu0 %v328_v0 }
  0x33   :  { %265 = vmatpush3.bf16.msra.mxu0 %v264_v25 }
  0x36   :  { %240 = vmatmul.mubr.f32.vlgmr.msra.gmra.mrb[0].mxu0 %v48_v26 }
 0x109   :  { %v137_v28 = vpop.f32.mrb[0].mxu0 }
 0x10a   :  { %v138_v29 = vadd.f32 %v187_v27, %v137_v28  ;;  %v241_v30 = vpop.f32.mrb[1].mxu0 }
 0x10c   :  { %v141_v32 = vmax.f32 %v138_v29, 0.0 }
 0x10e   :  { %v148_v33 = vmul.f32 %v188_v31, %v141_v32 }
 0x110   :  { %156 = vadd.xlane.f32.xlu0 %v148_v33 }
 0x19d   :  { %v157_v35 = vpop.xlane.xlu0 %156 }
 0x19e   :  { %v160_v36 = vadd.f32 %v159_v34, %v157_v35 }
 0x1a0   :  { %v189_v37 = vmul.f32 -1.442695, %v160_v36 }
 0x1a2   :  { %273 = vpow2.f32 %v189_v37 }
 0x1ac   :  { %v274_v38 = vpop.eup %273 }
 0x1ad   :  { %v164_v39 = vadd.f32 1.0, %v274_v38 }
 0x1af   :  { %275 = vrcp.f32 %v164_v39 }
 0x1b9   :  { %v276_v40 = vpop.eup %275 }
 0x1ba   :  { %v168_v41 = vmul.f32 %v276_v40, %v48_v26 }
 0x1bc   :  { %169 = vst [vmem:[#allocation7] sm:$0xff] %v168_v41 }
 0x1bd   :  { %310 = shalt.err (!%p307_p12)
}
 0x1be   :  { %s311_s15 = scalar_lea.hbm %s403_s5, 128 }
 0x1bf   :  { %p312_p13 = scmp.ne.s32.totalorder %s403_s5, %s311_s15  ;;  %p315_p0 = scmp.lt.u32.totalorder %s311_s15, %s403_s5 }
 0x1c1   :  { %p317_p1 = pnand %p315_p0, %p312_p13 }
 0x1c3   :  { %320 = shalt.err (!%p317_p1)
}
 0x1c4   :  { %179 = dma.vmem_to_hbm [thread:$0]  %s177_s2, 128, %s403_s5, [#allocation6]  }
 0x1c5   :  { %323 = dma.done.wait [#allocation6], 128  }
 0x1c6   :  { %324 = vsyncadd [#allocation6], 4294967168 }
 0x1c7   :  { %183 = vsyncpa [#allocation5], 1 }
 0x1c8   :  { %184 = vsyncpa [#allocation6], 1 }

</bundles_post_ra>
